<compile_context>
chip_gen: v5e
topology: v5e:2x2
jax: 0.10.0
libtpu: 0.0.40
codegen_flags: <defaults>
</compile_context>

<pallas_src>
import functools
import re

import jax
import jax.numpy as jnp
from jax.experimental import pallas as pl
from jax.experimental.pallas import tpu as pltpu

_LANE = 128
_MAX_TILE_B = 2048


def _round_up(n, m):
    return (n + m - 1) // m * m


_BF16_TANH_CACHE = None


def _bf16_tanh_ok():
    """bf16 EUP exists on v6e/v7x; keep f32 tanh on v5e and older."""
    global _BF16_TANH_CACHE
    if _BF16_TANH_CACHE is None:
        try:
            kind = jax.devices()[0].device_kind.lower()
            m = re.search(r"v(\d+)", kind)
            _BF16_TANH_CACHE = (int(m.group(1)) >= 6) if m else True
        except Exception:  # pragma: no cover - conservative fallback
            _BF16_TANH_CACHE = True
    return _BF16_TANH_CACHE


# --------------------------------------------------------------------------- #
# Kernels
# --------------------------------------------------------------------------- #
def _mlp_logits(x_ref, w1_ref, b1_ref, w2_ref, b2_ref, w3_ref, b3_ref,
                *, bf16_tanh):
    """bf16 matmuls on the MXU, f32 accumulation; tanh in bf16 on v6e/v7x."""
    x = x_ref[...]
    a1 = jnp.dot(x, w1_ref[...], preferred_element_type=jnp.float32) + b1_ref[...]
    h1 = jnp.tanh(a1.astype(jnp.bfloat16)) if bf16_tanh \
        else jnp.tanh(a1).astype(jnp.bfloat16)
    a2 = jnp.dot(h1, w2_ref[...], preferred_element_type=jnp.float32) + b2_ref[...]
    h2 = jnp.tanh(a2.astype(jnp.bfloat16)) if bf16_tanh \
        else jnp.tanh(a2).astype(jnp.bfloat16)
    logits = jnp.dot(h2, w3_ref[...],
                     preferred_element_type=jnp.float32) + b3_ref[...]
    return logits  # f32


def _ner_infer_kernel(x_ref, w1_ref, b1_ref, w2_ref, b2_ref, w3_ref, b3_ref,
                      logits_ref, *, bf16_tanh):
    """Inference path: logits only, no dead cross-entropy work."""
    logits = _mlp_logits(x_ref, w1_ref, b1_ref, w2_ref, b2_ref, w3_ref, b3_ref,
                         bf16_tanh=bf16_tanh)
    logits_ref[...] = logits.astype(logits_ref.dtype)   # bf16, lane-dense store


def _ner_loss_kernel(x_ref, w1_ref, b1_ref, w2_ref, b2_ref, w3_ref, b3_ref,
                     labels_ref, logits_ref, loss_ref, *, bf16_tanh):
    """Training path: bf16 logits + per-row cross-entropy (summed in wrapper)."""
    logits = _mlp_logits(x_ref, w1_ref, b1_ref, w2_ref, b2_ref, w3_ref, b3_ref,
                         bf16_tanh=bf16_tanh)
    logits_ref[...] = logits.astype(logits_ref.dtype)

    # Numerically stable log-softmax cross-entropy on the f32 logits.  Padded
    # class columns carry a -1e9 bias so exp() underflows to 0 and they drop
    # out of the sum; padded batch rows are sliced away in the wrapper.
    m = jnp.max(logits, axis=-1, keepdims=True)
    lse = jnp.log(jnp.sum(jnp.exp(logits - m), axis=-1, keepdims=True)) + m
    onehot = (jax.lax.broadcasted_iota(jnp.int32, logits.shape, 1)
              == labels_ref[...]).astype(jnp.float32)
    target = jnp.sum(onehot * logits, axis=-1, keepdims=True)
    loss_ref[...] = lse - target        # (tile_b, 1) per-row partial loss


# --------------------------------------------------------------------------- #
# Parameter preparation (call once, reuse every forward)
# --------------------------------------------------------------------------- #
def prepare_params(params):
    """Pad to lane width + cast to bf16 once, outside the per-call path."""
    V, H = params["w1"].shape
    C = params["w3"].shape[1]
    V_pad, H_pad, C_pad = (_round_up(n, _LANE) for n in (V, H, C))

    arrays = {
        "w1": jnp.zeros((V_pad, H_pad), jnp.bfloat16).at[:V, :H].set(
            params["w1"].astype(jnp.bfloat16)),
        "b1": jnp.zeros((1, H_pad), jnp.float32).at[:, :H].set(
            params["b1"].reshape(1, H)),
        "w2": jnp.zeros((H_pad, H_pad), jnp.bfloat16).at[:H, :H].set(
            params["w2"].astype(jnp.bfloat16)),
        "b2": jnp.zeros((1, H_pad), jnp.float32).at[:, :H].set(
            params["b2"].reshape(1, H)),
        "w3": jnp.zeros((H_pad, C_pad), jnp.bfloat16).at[:H, :C].set(
            params["w3"].astype(jnp.bfloat16)),
        # Padded logit columns get a huge negative bias so softmax ignores them.
        "b3": jnp.full((1, C_pad), -1e9, jnp.float32).at[:, :C].set(
            params["b3"].reshape(1, C)),
    }
    return arrays, (V, H, C)


# --------------------------------------------------------------------------- #
# Wrapper
# --------------------------------------------------------------------------- #
@functools.partial(jax.jit, static_argnames=("dims", "has_labels", "bf16_tanh"))
def _ner_forward_pallas(x, arrays, labels_i32, dims, has_labels, bf16_tanh):
    B, V = x.shape
    V_dim, H, C = dims
    V_pad, H_pad, C_pad = (_round_up(n, _LANE) for n in (V_dim, H, C))

    # Batch tiling: as few grid steps as possible (per-step overhead bound);
    # tile rounded to a multiple of 16 (bf16 sublane packing), capped ~2048.
    nb = max(1, pl.cdiv(B, _MAX_TILE_B))
    tile_b = _round_up(pl.cdiv(B, nb), 16)
    B_pad = nb * tile_b

    # Per-call input prep: only x (and labels) need padding / bf16 cast.
    x_p = jnp.zeros((B_pad, V_pad), jnp.bfloat16).at[:B, :V].set(
        x.astype(jnp.bfloat16))

    x_spec = pl.BlockSpec((tile_b, V_pad), lambda i: (i, 0))
    weight_specs = [
        pl.BlockSpec((V_pad, H_pad), lambda i: (0, 0)),   # w1 (VMEM-resident)
        pl.BlockSpec((1, H_pad), lambda i: (0, 0)),       # b1
        pl.BlockSpec((H_pad, H_pad), lambda i: (0, 0)),   # w2
        pl.BlockSpec((1, H_pad), lambda i: (0, 0)),       # b2
        pl.BlockSpec((H_pad, C_pad), lambda i: (0, 0)),   # w3
        pl.BlockSpec((1, C_pad), lambda i: (0, 0)),       # b3
    ]
    logits_spec = pl.BlockSpec((tile_b, C_pad), lambda i: (i, 0))

    # Explicit VMEM budget with headroom (double-buffered I/O tiles + resident
    # weights + f32 temporaries), clamped under v7x's 64 MiB physical VMEM.
    w_bytes = ((V_pad * H_pad + H_pad * H_pad + H_pad * C_pad) * 2
               + (2 * H_pad + C_pad) * 4)
    io_bytes = tile_b * (V_pad * 2 + C_pad * 2 + 4 + 4)     # x, logits, labels, loss
    tmp_bytes = 3 * tile_b * max(H_pad, C_pad) * 4           # f32 h1/h2/logits
    vmem_limit = int(min(max(2 * (2 * io_bytes + w_bytes + tmp_bytes), 32 << 20),
                         56 << 20))
    compiler_params = pltpu.CompilerParams(
        dimension_semantics=("parallel",), vmem_limit_bytes=vmem_limit)

    flops = 2 * B_pad * (V_pad * H_pad + H_pad * H_pad + H_pad * C_pad)
    transcendentals = B_pad * (2 * H_pad + (C_pad if has_labels else 0))
    bytes_accessed = (B_pad * V_pad * 2 + B_pad * C_pad * 2 + w_bytes
                      + (B_pad * 8 if has_labels else 0))
    cost = pl.CostEstimate(flops=flops, transcendentals=transcendentals,
                           bytes_accessed=bytes_accessed)

    if not has_labels:
        kernel = functools.partial(_ner_infer_kernel, bf16_tanh=bf16_tanh)
        logits_pad = pl.pallas_call(
            kernel,
            out_shape=jax.ShapeDtypeStruct((B_pad, C_pad), jnp.bfloat16),
            grid=(nb,),
            in_specs=[x_spec] + weight_specs,
            out_specs=logits_spec,
            compiler_params=compiler_params,
            cost_estimate=cost,
        )(x_p, arrays["w1"], arrays["b1"], arrays["w2"], arrays["b2"],
          arrays["w3"], arrays["b3"])
        return logits_pad[:B, :C].astype(jnp.float32), None

    labels_p = jnp.zeros((B_pad, 1), jnp.int32).at[:B, 0].set(
        labels_i32.reshape(-1))
    kernel = functools.partial(_ner_loss_kernel, bf16_tanh=bf16_tanh)
    logits_pad, loss_rows = pl.pallas_call(
        kernel,
        out_shape=(
            jax.ShapeDtypeStruct((B_pad, C_pad), jnp.bfloat16),
            jax.ShapeDtypeStruct((B_pad, 1), jnp.float32),
        ),
        grid=(nb,),
        in_specs=[x_spec] + weight_specs
        + [pl.BlockSpec((tile_b, 1), lambda i: (i, 0))],
        out_specs=(
            logits_spec,
            pl.BlockSpec((tile_b, 1), lambda i: (i, 0)),
        ),
        compiler_params=compiler_params,
        cost_estimate=cost,
    )(x_p, arrays["w1"], arrays["b1"], arrays["w2"], arrays["b2"],
      arrays["w3"], arrays["b3"], labels_p)

    # Final reduction (mean over the real rows) in the wrapper -> the grid
    # axis stays "parallel" (shards across both v7x TensorCores).
    loss = jnp.sum(loss_rows[:B, 0]) * (1.0 / B)
    return logits_pad[:B, :C].astype(jnp.float32), loss


def ner_forward(x, prepared_params, labels=None):
    """Mirrors NerNN.forward(input_ids, labels=None) -> (logits, loss_or_None).

    `prepared_params` must come from prepare_params(params) (padding/casting is
    hoisted out of the per-call path).
    """
    arrays, dims = prepared_params
    bf16_tanh = _bf16_tanh_ok()
    if labels is None:
        dummy = jnp.zeros((x.shape[0],), dtype=jnp.int32)
        return _ner_forward_pallas(x, arrays, dummy, dims,
                                   has_labels=False, bf16_tanh=bf16_tanh)
    labels_i32 = labels.astype(jnp.int32).reshape(-1)
    return _ner_forward_pallas(x, arrays, labels_i32, dims,
                               has_labels=True, bf16_tanh=bf16_tanh)


def init_params(key, vec_dim, num_classes, hidden_dim=128):
    """Deterministic init mimicking nn.Linear (uniform +-1/sqrt(fan_in)).

    Weights stored (in_features, out_features) so the kernel does x @ W.
    Biases stored (1, out_features) for 2-D layout.
    """
    keys = jax.random.split(key, 6)

    def linear(kw, kb, fan_in, fan_out):
        bound = 1.0 / jnp.sqrt(fan_in)
        w = jax.random.uniform(kw, (fan_in, fan_out), jnp.float32, -bound, bound)
        b = jax.random.uniform(kb, (1, fan_out), jnp.float32, -bound, bound)
        return w, b

    w1, b1 = linear(keys[0], keys[1], vec_dim, hidden_dim)
    w2, b2 = linear(keys[2], keys[3], hidden_dim, hidden_dim)
    w3, b3 = linear(keys[4], keys[5], hidden_dim, num_classes)
    return {"w1": w1, "b1": b1, "w2": w2, "b2": b2, "w3": w3, "b3": b3}


def _reference_forward(x, params, labels=None):
    """Pure-JAX f32 reference for correctness checking."""
    h1 = jnp.tanh(x @ params["w1"] + params["b1"])
    h2 = jnp.tanh(h1 @ params["w2"] + params["b2"])
    logits = h2 @ params["w3"] + params["b3"]
    if labels is None:
        return logits, None
    lse = jax.nn.logsumexp(logits, axis=-1)
    tgt = jnp.take_along_axis(logits, labels[:, None], axis=-1)[:, 0]
    return logits, jnp.mean(lse - tgt)


if __name__ == "__main__":
    # Shapes consistent with the module: vec_dim=32, hidden_dim=128, classes=8.
    # B=300 is not a multiple of 16, exercising the padded tail rows.
    V, H, C = 32, 128, 8
    B = 300

    key = jax.random.PRNGKey(0)
    k_params, k_x, k_lbl = jax.random.split(key, 3)

    params = init_params(k_params, vec_dim=V, num_classes=C, hidden_dim=H)
    prepared = prepare_params(params)          # pad + bf16 cast once
    x = jax.random.normal(k_x, (B, V), dtype=jnp.float32)
    labels = jax.random.randint(k_lbl, (B,), 0, C, dtype=jnp.int32)

    # Inference path (labels=None): loss-free kernel.
    logits_only, none_loss = ner_forward(x, prepared, labels=None)
    jax.block_until_ready(logits_only)
    assert none_loss is None

    # Training-style path: logits + mean cross-entropy.
    logits, loss = ner_forward(x, prepared, labels=labels)
    jax.block_until_ready((logits, loss))

    # Tiny-batch path (single 16-row padded tile).
    small_logits, small_loss = ner_forward(x[:8], prepared, labels=labels[:8])
    jax.block_until_ready((small_logits, small_loss))

    # Correctness vs pure-f32 JAX reference.  Kernel matmuls, (v6e/v7x) tanh
    # and the logits store run in bf16, so tolerances are loosened accordingly;
    # the loss is computed from the f32 logits accumulator in-kernel.
    ref_logits, ref_loss = _reference_forward(x, params, labels)
    assert jnp.allclose(logits, ref_logits, atol=7.5e-2, rtol=5e-2), float(
        jnp.max(jnp.abs(logits - ref_logits)))
    assert jnp.allclose(loss, ref_loss, atol=5e-2, rtol=5e-2), (
        float(loss), float(ref_loss))
    assert jnp.allclose(logits_only, ref_logits, atol=7.5e-2, rtol=5e-2)

    sref_logits, sref_loss = _reference_forward(x[:8], params, labels[:8])
    assert jnp.allclose(small_logits, sref_logits, atol=7.5e-2, rtol=5e-2)
    assert jnp.allclose(small_loss, sref_loss, atol=5e-2, rtol=5e-2)

    print("KERNEL_OK")
</pallas_src>

<mosaic_0001>
module attributes {stable_mosaic.version = 11 : i64} {
  func.func @_ner_infer_kernel(%arg0: i32, %arg1: memref<304x128xbf16, #tpu.memory_space<vmem>>, %arg2: memref<128x128xbf16, #tpu.memory_space<vmem>>, %arg3: memref<1x128xf32, #tpu.memory_space<vmem>>, %arg4: memref<128x128xbf16, #tpu.memory_space<vmem>>, %arg5: memref<1x128xf32, #tpu.memory_space<vmem>>, %arg6: memref<128x128xbf16, #tpu.memory_space<vmem>>, %arg7: memref<1x128xf32, #tpu.memory_space<vmem>>, %arg8: memref<304x128xbf16, #tpu.memory_space<vmem>>) attributes {dimension_semantics = [#tpu.dimension_semantics<parallel>], iteration_bounds = array<i64: 1>, scalar_prefetch = 0 : i64, scratch_operands = 0 : i64, tpu.core_type = #tpu.core_type<tc>, window_params = [{transform_indices = @transform_0, window_bounds = array<i64: 304, 128>}, {pipeline_mode = #tpu.pipeline_mode<synchronous>, transform_indices = @transform_1, window_bounds = array<i64: 128, 128>}, {pipeline_mode = #tpu.pipeline_mode<synchronous>, transform_indices = @transform_2, window_bounds = array<i64: 1, 128>}, {pipeline_mode = #tpu.pipeline_mode<synchronous>, transform_indices = @transform_3, window_bounds = array<i64: 128, 128>}, {pipeline_mode = #tpu.pipeline_mode<synchronous>, transform_indices = @transform_4, window_bounds = array<i64: 1, 128>}, {pipeline_mode = #tpu.pipeline_mode<synchronous>, transform_indices = @transform_5, window_bounds = array<i64: 128, 128>}, {pipeline_mode = #tpu.pipeline_mode<synchronous>, transform_indices = @transform_6, window_bounds = array<i64: 1, 128>}, {transform_indices = @transform_7, window_bounds = array<i64: 304, 128>}]} {
    %c0 = arith.constant 0 : index
    %c0_0 = arith.constant 0 : index
    %0 = vector.load %arg1[%c0, %c0_0] : memref<304x128xbf16, #tpu.memory_space<vmem>>, vector<304x128xbf16>
    %c0_1 = arith.constant 0 : index
    %c0_2 = arith.constant 0 : index
    %1 = vector.load %arg2[%c0_1, %c0_2] : memref<128x128xbf16, #tpu.memory_space<vmem>>, vector<128x128xbf16>
    %cst = arith.constant dense<0.000000e+00> : vector<304x128xf32>
    %2 = tpu.matmul %0, %1, %cst {dimension_numbers = #tpu.dot_dimension_numbers<[1], [0], [0], [1], [0, 0, 1, 1], [], []>} : vector<304x128xbf16>, vector<128x128xbf16>, vector<304x128xf32> -> vector<304x128xf32>
    %c0_3 = arith.constant 0 : index
    %c0_4 = arith.constant 0 : index
    %3 = vector.load %arg3[%c0_3, %c0_4] : memref<1x128xf32, #tpu.memory_space<vmem>>, vector<1x128xf32>
    %4 = vector.broadcast %3 : vector<1x128xf32> to vector<304x128xf32>
    %5 = arith.addf %2, %4 : vector<304x128xf32>
    %6 = arith.truncf %5 : vector<304x128xf32> to vector<304x128xbf16>
    %7 = math.tanh %6 : vector<304x128xbf16>
    %c0_5 = arith.constant 0 : index
    %c0_6 = arith.constant 0 : index
    %8 = vector.load %arg4[%c0_5, %c0_6] : memref<128x128xbf16, #tpu.memory_space<vmem>>, vector<128x128xbf16>
    %cst_7 = arith.constant dense<0.000000e+00> : vector<304x128xf32>
    %9 = tpu.matmul %7, %8, %cst_7 {dimension_numbers = #tpu.dot_dimension_numbers<[1], [0], [0], [1], [0, 0, 1, 1], [], []>} : vector<304x128xbf16>, vector<128x128xbf16>, vector<304x128xf32> -> vector<304x128xf32>
    %c0_8 = arith.constant 0 : index
    %c0_9 = arith.constant 0 : index
    %10 = vector.load %arg5[%c0_8, %c0_9] : memref<1x128xf32, #tpu.memory_space<vmem>>, vector<1x128xf32>
    %11 = vector.broadcast %10 : vector<1x128xf32> to vector<304x128xf32>
    %12 = arith.addf %9, %11 : vector<304x128xf32>
    %13 = arith.truncf %12 : vector<304x128xf32> to vector<304x128xbf16>
    %14 = math.tanh %13 : vector<304x128xbf16>
    %c0_10 = arith.constant 0 : index
    %c0_11 = arith.constant 0 : index
    %15 = vector.load %arg6[%c0_10, %c0_11] : memref<128x128xbf16, #tpu.memory_space<vmem>>, vector<128x128xbf16>
    %cst_12 = arith.constant dense<0.000000e+00> : vector<304x128xf32>
    %16 = tpu.matmul %14, %15, %cst_12 {dimension_numbers = #tpu.dot_dimension_numbers<[1], [0], [0], [1], [0, 0, 1, 1], [], []>} : vector<304x128xbf16>, vector<128x128xbf16>, vector<304x128xf32> -> vector<304x128xf32>
    %c0_13 = arith.constant 0 : index
    %c0_14 = arith.constant 0 : index
    %17 = vector.load %arg7[%c0_13, %c0_14] : memref<1x128xf32, #tpu.memory_space<vmem>>, vector<1x128xf32>
    %18 = vector.broadcast %17 : vector<1x128xf32> to vector<304x128xf32>
    %19 = arith.addf %16, %18 : vector<304x128xf32>
    %20 = arith.truncf %19 : vector<304x128xf32> to vector<304x128xbf16>
    %c0_15 = arith.constant 0 : index
    %c0_16 = arith.constant 0 : index
    %21 = vector.load %arg8[%c0_15, %c0_16] : memref<304x128xbf16, #tpu.memory_space<vmem>>, vector<304x128xbf16>
    tpu.vector_store %arg8[%c0_15, %c0_16], %20 {strides = array<i32>} : memref<304x128xbf16, #tpu.memory_space<vmem>>, vector<304x128xbf16>,
    return
  }
  func.func @transform_0(%arg0: i32) -> (i32, i32) {
    %c0_i32 = arith.constant 0 : i32
    %c0_i32_0 = arith.constant 0 : i32
    return %arg0, %c0_i32 : i32, i32
  }
  func.func @transform_1(%arg0: i32) -> (i32, i32) {
    %c0_i32 = arith.constant 0 : i32
    %c0_i32_0 = arith.constant 0 : i32
    %c0_i32_1 = arith.constant 0 : i32
    return %c0_i32, %c0_i32_0 : i32, i32
  }
  func.func @transform_2(%arg0: i32) -> (i32, i32) {
    %c0_i32 = arith.constant 0 : i32
    %c0_i32_0 = arith.constant 0 : i32
    %c0_i32_1 = arith.constant 0 : i32
    return %c0_i32, %c0_i32_0 : i32, i32
  }
  func.func @transform_3(%arg0: i32) -> (i32, i32) {
    %c0_i32 = arith.constant 0 : i32
    %c0_i32_0 = arith.constant 0 : i32
    %c0_i32_1 = arith.constant 0 : i32
    return %c0_i32, %c0_i32_0 : i32, i32
  }
  func.func @transform_4(%arg0: i32) -> (i32, i32) {
    %c0_i32 = arith.constant 0 : i32
    %c0_i32_0 = arith.constant 0 : i32
    %c0_i32_1 = arith.constant 0 : i32
    return %c0_i32, %c0_i32_0 : i32, i32
  }
  func.func @transform_5(%arg0: i32) -> (i32, i32) {
    %c0_i32 = arith.constant 0 : i32
    %c0_i32_0 = arith.constant 0 : i32
    %c0_i32_1 = arith.constant 0 : i32
    return %c0_i32, %c0_i32_0 : i32, i32
  }
  func.func @transform_6(%arg0: i32) -> (i32, i32) {
    %c0_i32 = arith.constant 0 : i32
    %c0_i32_0 = arith.constant 0 : i32
    %c0_i32_1 = arith.constant 0 : i32
    return %c0_i32, %c0_i32_0 : i32, i32
  }
  func.func @transform_7(%arg0: i32) -> (i32, i32) {
    %c0_i32 = arith.constant 0 : i32
    %c0_i32_0 = arith.constant 0 : i32
    return %arg0, %c0_i32 : i32, i32
  }
}

</mosaic_0001>

<bundles_post_ra>
// kernel: _ner_forward_pallas.1
= control target key start
LH: loop header
LB: loop body
LE: loop exit
PB: predicated region body
PF: predicated region fallthrough
CT: control target
= control target key end

     0   :  { %s1864_s1 = inlined_call_operand.vmem [shape: bf16[128,128], index: 1, kind: input, shape index: {}]   ;;  %s1865_s2 = inlined_call_operand.vmem [shape: f32[1,128], index: 2, kind: input, shape index: {}]   ;;  %s1866_s0 = inlined_call_operand.vmem [shape: bf16[304,128], index: 0, kind: input, shape index: {}]   ;;  %s1867_s3 = inlined_call_operand.vmem [shape: bf16[128,128], index: 3, kind: input, shape index: {}]   ;;  %s1868_s4 = inlined_call_operand.vmem [shape: f32[1,128], index: 4, kind: input, shape index: {}]   ;;  %s1869_s5 = inlined_call_operand.vmem [shape: bf16[128,128], index: 5, kind: input, shape index: {}]   ;;  %s1870_s6 = inlined_call_operand.vmem [shape: f32[1,128], index: 6, kind: input, shape index: {}]   ;;  %s1871_s7 = inlined_call_operand.vmem [shape: bf16[304,128], index: 7, kind: output, shape index: {}]  }
   0x1   :  { %v1200_v0 = vld [vmem:[%s1864_s1 + $0x38] sm:$0xff]  ;;  %v1199_v1 = vld [vmem:[%s1864_s1 + $0x30] sm:$0xff]  ;;  %v1198_v2 = vld [vmem:[%s1864_s1 + $0x28] sm:$0xff] }
   0x2   :  { %246 = vmatpush.bf16.msra.mxu0 %v1200_v0  ;;  %1330 = vmatpush.bf16.msra.mxu3 %v1200_v0  ;;  %v1197_v3 = vld [vmem:[%s1864_s1 + $0x20] sm:$0xff]  ;;  %v1196_v4 = vld [vmem:[%s1864_s1 + $0x18] sm:$0xff]  ;;  %v1195_v5 = vld [vmem:[%s1864_s1 + $0x10] sm:$0xff] }
   0x3   :  { %v1194_v6 = vld [vmem:[%s1864_s1 + $0x8] sm:$0xff]  ;;  %v1193_v7 = vld [vmem:[%s1864_s1] sm:$0xff]  ;;  %v1176_v10 = vld [vmem:[%s1866_s0 + $0x10] sm:$0xff] }
   0x4   :  { %v1174_v8 = vld [vmem:[%s1866_s0] sm:$0xff]  ;;  %v1175_v9 = vld [vmem:[%s1866_s0 + $0x8] sm:$0xff]  ;;  %v1177_v11 = vld [vmem:[%s1866_s0 + $0x18] sm:$0xff] }
   0x5   :  { %v1178_v12 = vld [vmem:[%s1866_s0 + $0x20] sm:$0xff]  ;;  %v1179_v13 = vld [vmem:[%s1866_s0 + $0x28] sm:$0xff]  ;;  %v1208_v14 = vld [vmem:[%s1867_s3 + $0x38] sm:$0xff] }
   0x6   :  { %247 = vmatpush.bf16.msra.mxu0 %v1199_v1  ;;  %1331 = vmatpush.bf16.msra.mxu3 %v1199_v1  ;;  %v1207_v15 = vld [vmem:[%s1867_s3 + $0x30] sm:$0xff]  ;;  %v1206_v17 = vld [vmem:[%s1867_s3 + $0x28] sm:$0xff]  ;;  %v1205_v18 = vld [vmem:[%s1867_s3 + $0x20] sm:$0xff] }
   0x7   :  { %532 = vmatpush.bf16.msra.mxu1 %v1208_v14  ;;  %v1180_v16 = vld [vmem:[%s1866_s0 + $0x30] sm:$0xff]  ;;  %v1204_v19 = vld [vmem:[%s1867_s3 + $0x18] sm:$0xff]  ;;  %v1202_v23 = vld [vmem:[%s1867_s3 + $0x8] sm:$0xff] }
   0x8   :  { %v1203_v20 = vld [vmem:[%s1867_s3 + $0x10] sm:$0xff]  ;;  %v1189_v21 = vld [vmem:[%s1866_s0 + $0x78] sm:$0xff]  ;;  %v1201_v24 = vld [vmem:[%s1867_s3] sm:$0xff] }
   0x9   :  { %v1181_v22 = vld [vmem:[%s1866_s0 + $0x38] sm:$0xff]  ;;  %v1190_v25 = vld [vmem:[%s1866_s0 + $0x80] sm:$0xff]  ;;  %v1191_v35 = vld [vmem:[%s1866_s0 + $0x88] sm:$0xff] }
   0xa   :  { %248 = vmatpush.bf16.msra.mxu0 %v1198_v2  ;;  %1332 = vmatpush.bf16.msra.mxu3 %v1198_v2  ;;  %v1182_v26 = vld [vmem:[%s1866_s0 + $0x40] sm:$0xff]  ;;  %v1183_v36 = vld [vmem:[%s1866_s0 + $0x48] sm:$0xff]  ;;  %v1192_v47 = vld [vmem:[%s1866_s0 + $0x90] sm:$0xff] }
   0xb   :  { %533 = vmatpush.bf16.msra.mxu1 %v1207_v15  ;;  %v1633_v28 = vld [vmem:[%s1865_s2] ss:$0 sm:$0xff]  ;;  %v1184_v48 = vld [vmem:[%s1866_s0 + $0x50] sm:$0xff]  ;;  %v1185_v59 = vld [vmem:[%s1866_s0 + $0x58] sm:$0xff] }
   0xe   :  { %249 = vmatpush.bf16.msra.mxu0 %v1197_v3  ;;  %1333 = vmatpush.bf16.msra.mxu3 %v1197_v3 }
   0xf   :  { %534 = vmatpush.bf16.msra.mxu1 %v1206_v17 }
  0x12   :  { %250 = vmatpush.bf16.msra.mxu0 %v1196_v4  ;;  %1334 = vmatpush.bf16.msra.mxu3 %v1196_v4 }
  0x13   :  { %535 = vmatpush.bf16.msra.mxu1 %v1205_v18 }
  0x16   :  { %251 = vmatpush.bf16.msra.mxu0 %v1195_v5  ;;  %1335 = vmatpush.bf16.msra.mxu3 %v1195_v5 }
  0x17   :  { %536 = vmatpush.bf16.msra.mxu1 %v1204_v19 }
  0x1a   :  { %252 = vmatpush.bf16.msra.mxu0 %v1194_v6  ;;  %1336 = vmatpush.bf16.msra.mxu3 %v1194_v6  ;;  %v1186_v6 = vld [vmem:[%s1866_s0 + $0x60] sm:$0xff] }
  0x1b   :  { %537 = vmatpush.bf16.msra.mxu1 %v1203_v20 }
  0x1e   :  { %253 = vmatpush.bf16.msra.mxu0 %v1193_v7  ;;  %1337 = vmatpush.bf16.msra.mxu3 %v1193_v7 }
  0x1f   :  { %538 = vmatpush.bf16.msra.mxu1 %v1202_v23 }
  0x21   :  { %254 = vmatmul.bf16.vlgmr.msra.gmra.mxu0 %v1174_v8  ;;  %329 = vmatmul.bf16.vlgmr.msra.gmra.mxu3 %v1189_v21 }
  0x22   :  { %1338 = vmatpush.bf16.msrb.mxu3 %v1208_v14 }
  0x23   :  { %539 = vmatpush.bf16.msra.mxu1 %v1201_v24 }
  0x26   :  { %1339 = vmatpush.bf16.msrb.mxu3 %v1207_v15 }
  0x2a   :  { %1340 = vmatpush.bf16.msrb.mxu3 %v1206_v17  ;;  %v1187_v17 = vld [vmem:[%s1866_s0 + $0x68] sm:$0xff] }
  0x2e   :  { %1341 = vmatpush.bf16.msrb.mxu3 %v1205_v18 }
  0x31   :  { %259 = vmatmul.bf16.gmra.mxu0 %v1175_v9  ;;  %334 = vmatmul.bf16.gmra.mxu3 %v1190_v25 }
  0x32   :  { %1342 = vmatpush.bf16.msrb.mxu3 %v1204_v19 }
  0x36   :  { %1343 = vmatpush.bf16.msrb.mxu3 %v1203_v20 }
  0x3a   :  { %1344 = vmatpush.bf16.msrb.mxu3 %v1202_v23 }
  0x3e   :  { %1345 = vmatpush.bf16.msrb.mxu3 %v1201_v24 }
  0x41   :  { %264 = vmatmul.bf16.gmra.mxu0 %v1176_v10  ;;  %339 = vmatmul.bf16.gmra.mxu3 %v1191_v35 }
  0x51   :  { %269 = vmatmul.bf16.gmra.mxu0 %v1177_v11  ;;  %344 = vmatmul.bf16.gmra.mxu3 %v1192_v47 }
  0x61   :  { %274 = vmatmul.bf16.gmra.mxu0 %v1178_v12 }
  0x71   :  { %279 = vmatmul.bf16.gmra.mxu0 %v1179_v13 }
  0x81   :  { %284 = vmatmul.bf16.gmra.mxu0 %v1180_v16 }
  0x91   :  { %289 = vmatmul.bf16.gmra.mxu0 %v1181_v22 }
  0x9e   :  { %v255_v27 = vpop.f32.mrf.mxu0 }
  0x9f   :  { %v256_v30 = vadd.f32 %v1633_v28, %v255_v27 }
  0xa1   :  { %294 = vmatmul.bf16.gmra.mxu0 %v1182_v26 }
  0xa6   :  { %v257_v29 = vpop.f32.mrf.mxu0 }
  0xa7   :  { %v258_v31 = vadd.f32 %v1633_v28, %v257_v29  ;;  %v1188_v29 = vld [vmem:[%s1866_s0 + $0x70] sm:$0xff] }
  0xa9   :  { %v350_v32 = vpack.c.bf16 %v258_v31, %v256_v30 }
  0xab   :  { %v369_v33 = vunpack.c.l.bf16 %v350_v32  ;;  %v370_v34 = vunpack.c.h.bf16 %v350_v32 }
  0xad   :  { %1357 = vtanh.f32 %v369_v33 }
  0xae   :  { %1359 = vtanh.f32 %v370_v34  ;;  %v260_v37 = vpop.f32.mrf.mxu0 }
  0xaf   :  { %v261_v42 = vadd.f32 %v1633_v28, %v260_v37 }
  0xb1   :  { %299 = vmatmul.bf16.gmra.mxu0 %v1183_v36 }
  0xb3   :  { %v1358_v38 = vpop.eup %1357 }
  0xb4   :  { %v1360_v39 = vpop.eup %1359 }
  0xb5   :  { %v445_v40 = vpack.c.bf16 %v1360_v39, %v1358_v38 }
  0xb6   :  { %v262_v41 = vpop.f32.mrf.mxu0 }
  0xb7   :  { %v263_v43 = vadd.f32 %v1633_v28, %v262_v41  ;;  %540 = vmatmul.bf16.vlgmr.msra.gmra.mxu1 %v445_v40  ;;  %v1216_v40 = vld [vmem:[%s1869_s5 + $0x38] sm:$0xff] }
  0xb8   :  { %818 = vmatpush.bf16.msra.mxu2 %v1216_v40  ;;  %1346 = vmatpush.bf16.msra.mxu3 %v1216_v40 }
  0xb9   :  { %v351_v44 = vpack.c.bf16 %v263_v43, %v261_v42  ;;  %v1215_v42 = vld [vmem:[%s1869_s5 + $0x30] sm:$0xff]  ;;  %v330_v43 = vpop.f32.mrf.mxu3 }
  0xbb   :  { %v371_v45 = vunpack.c.l.bf16 %v351_v44  ;;  %v372_v46 = vunpack.c.h.bf16 %v351_v44 }
  0xbc   :  { %819 = vmatpush.bf16.msra.mxu2 %v1215_v42  ;;  %1347 = vmatpush.bf16.msra.mxu3 %v1215_v42 }
  0xbd   :  { %1361 = vtanh.f32 %v371_v45  ;;  %v1214_v45 = vld [vmem:[%s1869_s5 + $0x28] sm:$0xff] }
  0xbe   :  { %1363 = vtanh.f32 %v372_v46  ;;  %v265_v49 = vpop.f32.mrf.mxu0 }
  0xbf   :  { %v266_v54 = vadd.f32 %v1633_v28, %v265_v49 }
  0xc0   :  { %820 = vmatpush.bf16.msra.mxu2 %v1214_v45  ;;  %1348 = vmatpush.bf16.msra.mxu3 %v1214_v45 }
  0xc1   :  { %304 = vmatmul.bf16.gmra.mxu0 %v1184_v48 }
  0xc3   :  { %v1362_v50 = vpop.eup %1361 }
  0xc4   :  { %v1364_v51 = vpop.eup %1363 }
  0xc5   :  { %v446_v52 = vpack.c.bf16 %v1364_v51, %v1362_v50  ;;  %v1213_v51 = vld [vmem:[%s1869_s5 + $0x20] sm:$0xff] }
  0xc6   :  { %v267_v53 = vpop.f32.mrf.mxu0  ;;  %821 = vmatpush.bf16.msra.mxu2 %v1213_v51  ;;  %1349 = vmatpush.bf16.msra.mxu3 %v1213_v51 }
  0xc7   :  { %v268_v55 = vadd.f32 %v1633_v28, %v267_v53  ;;  %545 = vmatmul.bf16.gmra.mxu1 %v446_v52  ;;  %v331_v52 = vadd.f32 %v1633_v28, %v330_v43 }
  0xc9   :  { %v352_v56 = vpack.c.bf16 %v268_v55, %v266_v54  ;;  %v332_v54 = vpop.f32.mrf.mxu3 }
  0xca   :  { %v333_v55 = vadd.f32 %v1633_v28, %v332_v54 }
  0xcb   :  { %v373_v57 = vunpack.c.l.bf16 %v352_v56  ;;  %v374_v58 = vunpack.c.h.bf16 %v352_v56 }
  0xcd   :  { %1365 = vtanh.f32 %v373_v57 }
  0xce   :  { %1367 = vtanh.f32 %v374_v58  ;;  %v270_v60 = vpop.f32.mrf.mxu0  ;;  %v365_v58 = vpack.c.bf16 %v333_v55, %v331_v52 }
  0xcf   :  { %v271_v1 = vadd.f32 %v1633_v28, %v270_v60 }
  0xd1   :  { %309 = vmatmul.bf16.gmra.mxu0 %v1185_v59  ;;  %v1212_v59 = vld [vmem:[%s1869_s5 + $0x18] sm:$0xff] }
  0xd2   :  { %822 = vmatpush.bf16.msra.mxu2 %v1212_v59  ;;  %1350 = vmatpush.bf16.msra.mxu3 %v1212_v59 }
  0xd3   :  { %v1366_v61 = vpop.eup %1365 }
  0xd4   :  { %v1368_v62 = vpop.eup %1367 }
  0xd5   :  { %v447_v63 = vpack.c.bf16 %v1368_v62, %v1366_v61  ;;  %v399_v61 = vunpack.c.l.bf16 %v365_v58  ;;  %v400_v62 = vunpack.c.h.bf16 %v365_v58 }
  0xd6   :  { %v272_v0 = vpop.f32.mrf.mxu0 }
  0xd7   :  { %v273_v2 = vadd.f32 %v1633_v28, %v272_v0  ;;  %550 = vmatmul.bf16.gmra.mxu1 %v447_v63  ;;  %v1211_v63 = vld [vmem:[%s1869_s5 + $0x10] sm:$0xff]  ;;  %v335_v0 = vpop.f32.mrf.mxu3 }
  0xd8   :  { %823 = vmatpush.bf16.msra.mxu2 %v1211_v63  ;;  %1351 = vmatpush.bf16.msra.mxu3 %v1211_v63 }
  0xd9   :  { %v353_v3 = vpack.c.bf16 %v273_v2, %v271_v1 }
  0xdb   :  { %v375_v4 = vunpack.c.l.bf16 %v353_v3  ;;  %v376_v5 = vunpack.c.h.bf16 %v353_v3  ;;  %v1210_v3 = vld [vmem:[%s1869_s5 + $0x8] sm:$0xff] }
  0xdc   :  { %824 = vmatpush.bf16.msra.mxu2 %v1210_v3  ;;  %1352 = vmatpush.bf16.msra.mxu3 %v1210_v3 }
  0xdd   :  { %1369 = vtanh.f32 %v375_v4 }
  0xde   :  { %1371 = vtanh.f32 %v376_v5  ;;  %v275_v7 = vpop.f32.mrf.mxu0 }
  0xdf   :  { %v276_v12 = vadd.f32 %v1633_v28, %v275_v7 }
  0xe1   :  { %314 = vmatmul.bf16.gmra.mxu0 %v1186_v6 }
  0xe3   :  { %v1370_v8 = vpop.eup %1369 }
  0xe4   :  { %v1372_v9 = vpop.eup %1371 }
  0xe5   :  { %v448_v10 = vpack.c.bf16 %v1372_v9, %v1370_v8 }
  0xe6   :  { %v277_v11 = vpop.f32.mrf.mxu0 }
  0xe7   :  { %v278_v13 = vadd.f32 %v1633_v28, %v277_v11  ;;  %555 = vmatmul.bf16.gmra.mxu1 %v448_v10  ;;  %v1209_v11 = vld [vmem:[%s1869_s5] sm:$0xff] }
  0xe8   :  { %825 = vmatpush.bf16.msra.mxu2 %v1209_v11  ;;  %1353 = vmatpush.bf16.msra.mxu3 %v1209_v11 }
  0xe9   :  { %v354_v14 = vpack.c.bf16 %v278_v13, %v276_v12  ;;  %v336_v13 = vadd.f32 %v1633_v28, %v335_v0 }
  0xeb   :  { %v377_v15 = vunpack.c.l.bf16 %v354_v14  ;;  %v378_v16 = vunpack.c.h.bf16 %v354_v14  ;;  %v337_v14 = vpop.f32.mrf.mxu3 }
  0xed   :  { %1373 = vtanh.f32 %v377_v15 }
  0xee   :  { %1375 = vtanh.f32 %v378_v16  ;;  %v280_v18 = vpop.f32.mrf.mxu0 }
  0xef   :  { %v281_v23 = vadd.f32 %v1633_v28, %v280_v18 }
  0xf1   :  { %319 = vmatmul.bf16.gmra.mxu0 %v1187_v17  ;;  %v338_v17 = vadd.f32 %v1633_v28, %v337_v14 }
  0xf3   :  { %v1374_v19 = vpop.eup %1373  ;;  %v366_v18 = vpack.c.bf16 %v338_v17, %v336_v13 }
  0xf4   :  { %v1376_v20 = vpop.eup %1375 }
  0xf5   :  { %v449_v21 = vpack.c.bf16 %v1376_v20, %v1374_v19  ;;  %v401_v20 = vunpack.c.l.bf16 %v366_v18 }
  0xf6   :  { %v282_v22 = vpop.f32.mrf.mxu0 }
  0xf7   :  { %v283_v24 = vadd.f32 %v1633_v28, %v282_v22  ;;  %560 = vmatmul.bf16.gmra.mxu1 %v449_v21  ;;  %v402_v21 = vunpack.c.h.bf16 %v366_v18  ;;  %v340_v22 = vpop.f32.mrf.mxu3 }
  0xf9   :  { %v355_v25 = vpack.c.bf16 %v283_v24, %v281_v23 }
  0xfb   :  { %v379_v26 = vunpack.c.l.bf16 %v355_v25  ;;  %v380_v27 = vunpack.c.h.bf16 %v355_v25 }
  0xfd   :  { %1377 = vtanh.f32 %v379_v26 }
  0xfe   :  { %1379 = vtanh.f32 %v380_v27  ;;  %v285_v30 = vpop.f32.mrf.mxu0 }
  0xff   :  { %v286_v35 = vadd.f32 %v1633_v28, %v285_v30 }
 0x101   :  { %324 = vmatmul.bf16.gmra.mxu0 %v1188_v29 }
 0x103   :  { %v1378_v31 = vpop.eup %1377 }
 0x104   :  { %v1380_v32 = vpop.eup %1379 }
 0x105   :  { %v450_v33 = vpack.c.bf16 %v1380_v32, %v1378_v31 }
 0x106   :  { %v287_v34 = vpop.f32.mrf.mxu0 }
 0x107   :  { %v288_v36 = vadd.f32 %v1633_v28, %v287_v34  ;;  %565 = vmatmul.bf16.gmra.mxu1 %v450_v33  ;;  %v1710_v33 = vld [vmem:[%s1868_s4] ss:$0 sm:$0xff] }
 0x109   :  { %v356_v37 = vpack.c.bf16 %v288_v36, %v286_v35  ;;  %v341_v35 = vadd.f32 %v1633_v28, %v340_v22 }
 0x10b   :  { %v381_v38 = vunpack.c.l.bf16 %v356_v37  ;;  %v382_v39 = vunpack.c.h.bf16 %v356_v37  ;;  %v342_v37 = vpop.f32.mrf.mxu3 }
 0x10c   :  { %v343_v40 = vadd.f32 %v1633_v28, %v342_v37 }
 0x10d   :  { %1381 = vtanh.f32 %v381_v38 }
 0x10e   :  { %1383 = vtanh.f32 %v382_v39  ;;  %v290_v41 = vpop.f32.mrf.mxu0 }
 0x10f   :  { %v291_v49 = vadd.f32 %v1633_v28, %v290_v41 }
 0x113   :  { %v1382_v44 = vpop.eup %1381  ;;  %v345_v51 = vpop.f32.mrf.mxu3 }
 0x114   :  { %v1384_v46 = vpop.eup %1383  ;;  %v346_v63 = vadd.f32 %v1633_v28, %v345_v51 }
 0x115   :  { %v451_v47 = vpack.c.bf16 %v1384_v46, %v1382_v44  ;;  %v367_v44 = vpack.c.bf16 %v343_v40, %v341_v35 }
 0x116   :  { %v292_v48 = vpop.f32.mrf.mxu0 }
 0x117   :  { %v293_v50 = vadd.f32 %v1633_v28, %v292_v48  ;;  %570 = vmatmul.bf16.gmra.mxu1 %v451_v47  ;;  %v403_v47 = vunpack.c.l.bf16 %v367_v44  ;;  %v404_v48 = vunpack.c.h.bf16 %v367_v44 }
 0x119   :  { %v357_v53 = vpack.c.bf16 %v293_v50, %v291_v49 }
 0x11b   :  { %v383_v56 = vunpack.c.l.bf16 %v357_v53  ;;  %v384_v57 = vunpack.c.h.bf16 %v357_v53 }
 0x11d   :  { %1385 = vtanh.f32 %v383_v56 }
 0x11e   :  { %1387 = vtanh.f32 %v384_v57  ;;  %v295_v60 = vpop.f32.mrf.mxu0 }
 0x11f   :  { %1389 = vtanh.f32 %v399_v61  ;;  %v296_v8 = vadd.f32 %v1633_v28, %v295_v60 }
 0x120   :  { %1391 = vtanh.f32 %v400_v62 }
 0x123   :  { %v1386_v1 = vpop.eup %1385 }
 0x124   :  { %v1388_v2 = vpop.eup %1387 }
 0x125   :  { %v452_v4 = vpack.c.bf16 %v1388_v2, %v1386_v1  ;;  %v1390_v5 = vpop.eup %1389  ;;  %v347_v2 = vpop.f32.mrf.mxu3 }
 0x126   :  { %v297_v6 = vpop.f32.mrf.mxu0  ;;  %v1392_v7 = vpop.eup %1391 }
 0x127   :  { %v298_v9 = vadd.f32 %v1633_v28, %v297_v6  ;;  %575 = vmatmul.bf16.gmra.mxu1 %v452_v4  ;;  %v460_v10 = vpack.c.bf16 %v1392_v7, %v1390_v5  ;;  %v348_v6 = vadd.f32 %v1633_v28, %v347_v2 }
 0x129   :  { %v358_v12 = vpack.c.bf16 %v298_v9, %v296_v8  ;;  %615 = vmatmul.bf16.vlgmr.msrb.gmra.mxu3 %v460_v10  ;;  %v368_v10 = vpack.c.bf16 %v348_v6, %v346_v63 }
 0x12b   :  { %v385_v15 = vunpack.c.l.bf16 %v358_v12  ;;  %v386_v16 = vunpack.c.h.bf16 %v358_v12  ;;  %v405_v13 = vunpack.c.l.bf16 %v368_v10  ;;  %v406_v14 = vunpack.c.h.bf16 %v368_v10 }
 0x12d   :  { %1393 = vtanh.f32 %v385_v15 }
 0x12e   :  { %1395 = vtanh.f32 %v386_v16  ;;  %v300_v19 = vpop.f32.mrf.mxu0 }
 0x12f   :  { %1397 = vtanh.f32 %v401_v20  ;;  %v301_v30 = vadd.f32 %v1633_v28, %v300_v19 }
 0x130   :  { %1399 = vtanh.f32 %v402_v21 }
 0x133   :  { %v1394_v23 = vpop.eup %1393 }
 0x134   :  { %v1396_v24 = vpop.eup %1395  ;;  %v541_v25 = vpop.f32.mrf.mxu1 }
 0x135   :  { %v453_v26 = vpack.c.bf16 %v1396_v24, %v1394_v23  ;;  %v1398_v29 = vpop.eup %1397  ;;  %v542_v42 = vadd.f32 %v1710_v33, %v541_v25 }
 0x136   :  { %v302_v27 = vpop.f32.mrf.mxu0  ;;  %v1400_v32 = vpop.eup %1399 }
 0x137   :  { %v303_v31 = vadd.f32 %v1633_v28, %v302_v27  ;;  %580 = vmatmul.bf16.gmra.mxu1 %v453_v26  ;;  %v461_v36 = vpack.c.bf16 %v1400_v32, %v1398_v29 }
 0x139   :  { %v359_v34 = vpack.c.bf16 %v303_v31, %v301_v30  ;;  %620 = vmatmul.bf16.gmra.mxu3 %v461_v36 }
 0x13b   :  { %v387_v38 = vunpack.c.l.bf16 %v359_v34  ;;  %v388_v39 = vunpack.c.h.bf16 %v359_v34 }
 0x13c   :  { %v543_v41 = vpop.f32.mrf.mxu1 }
 0x13d   :  { %1401 = vtanh.f32 %v387_v38  ;;  %v544_v43 = vadd.f32 %v1710_v33, %v543_v41 }
 0x13e   :  { %1403 = vtanh.f32 %v388_v39  ;;  %v305_v45 = vpop.f32.mrf.mxu0 }
 0x13f   :  { %v636_v46 = vpack.c.bf16 %v544_v43, %v542_v42  ;;  %1405 = vtanh.f32 %v403_v47  ;;  %v306_v58 = vadd.f32 %v1633_v28, %v305_v45 }
 0x140   :  { %1407 = vtanh.f32 %v404_v48 }
 0x141   :  { %v655_v49 = vunpack.c.l.bf16 %v636_v46  ;;  %v656_v50 = vunpack.c.h.bf16 %v636_v46 }
 0x143   :  { %v1402_v52 = vpop.eup %1401  ;;  %1409 = vtanh.f32 %v655_v49 }
 0x144   :  { %v1404_v53 = vpop.eup %1403  ;;  %1411 = vtanh.f32 %v656_v50  ;;  %v546_v54 = vpop.f32.mrf.mxu1 }
 0x145   :  { %v454_v55 = vpack.c.bf16 %v1404_v53, %v1402_v52  ;;  %v1406_v57 = vpop.eup %1405  ;;  %v547_v8 = vadd.f32 %v1710_v33, %v546_v54 }
 0x146   :  { %v307_v56 = vpop.f32.mrf.mxu0  ;;  %v1408_v60 = vpop.eup %1407 }
 0x147   :  { %v308_v59 = vadd.f32 %v1633_v28, %v307_v56  ;;  %585 = vmatmul.bf16.gmra.mxu1 %v454_v55  ;;  %v462_v0 = vpack.c.bf16 %v1408_v60, %v1406_v57 }
 0x149   :  { %v1410_v61 = vpop.eup %1409  ;;  %v360_v62 = vpack.c.bf16 %v308_v59, %v306_v58  ;;  %625 = vmatmul.bf16.gmra.mxu3 %v462_v0 }
 0x14a   :  { %v1412_v1 = vpop.eup %1411 }
 0x14b   :  { %v389_v3 = vunpack.c.l.bf16 %v360_v62  ;;  %v390_v4 = vunpack.c.h.bf16 %v360_v62  ;;  %v731_v5 = vpack.c.bf16 %v1412_v1, %v1410_v61 }
 0x14c   :  { %v548_v7 = vpop.f32.mrf.mxu1 }
 0x14d   :  { %1413 = vtanh.f32 %v389_v3  ;;  %v549_v9 = vadd.f32 %v1710_v33, %v548_v7  ;;  %826 = vmatmul.bf16.vlgmr.msra.gmra.mxu2 %v731_v5 }
 0x14e   :  { %1415 = vtanh.f32 %v390_v4  ;;  %v310_v11 = vpop.f32.mrf.mxu0 }
 0x14f   :  { %v637_v12 = vpack.c.bf16 %v549_v9, %v547_v8  ;;  %1417 = vtanh.f32 %v405_v13  ;;  %v311_v23 = vadd.f32 %v1633_v28, %v310_v11 }
 0x150   :  { %1419 = vtanh.f32 %v406_v14 }
 0x151   :  { %v657_v15 = vunpack.c.l.bf16 %v637_v12  ;;  %v658_v16 = vunpack.c.h.bf16 %v637_v12 }
 0x153   :  { %v1414_v17 = vpop.eup %1413  ;;  %1421 = vtanh.f32 %v657_v15 }
 0x154   :  { %v1416_v18 = vpop.eup %1415  ;;  %1423 = vtanh.f32 %v658_v16  ;;  %v551_v19 = vpop.f32.mrf.mxu1 }
 0x155   :  { %v455_v20 = vpack.c.bf16 %v1416_v18, %v1414_v17  ;;  %v1418_v22 = vpop.eup %1417  ;;  %v552_v36 = vadd.f32 %v1710_v33, %v551_v19 }
 0x156   :  { %v312_v21 = vpop.f32.mrf.mxu0  ;;  %v1420_v25 = vpop.eup %1419 }
 0x157   :  { %v313_v24 = vadd.f32 %v1633_v28, %v312_v21  ;;  %590 = vmatmul.bf16.gmra.mxu1 %v455_v20  ;;  %v463_v29 = vpack.c.bf16 %v1420_v25, %v1418_v22 }
 0x159   :  { %v1422_v26 = vpop.eup %1421  ;;  %v361_v27 = vpack.c.bf16 %v313_v24, %v311_v23  ;;  %630 = vmatmul.bf16.gmra.mxu3 %v463_v29 }
 0x15a   :  { %v1424_v30 = vpop.eup %1423 }
 0x15b   :  { %v391_v31 = vunpack.c.l.bf16 %v361_v27  ;;  %v392_v32 = vunpack.c.h.bf16 %v361_v27  ;;  %v732_v34 = vpack.c.bf16 %v1424_v30, %v1422_v26 }
 0x15c   :  { %v553_v35 = vpop.f32.mrf.mxu1 }
 0x15d   :  { %1425 = vtanh.f32 %v391_v31  ;;  %v554_v37 = vadd.f32 %v1710_v33, %v553_v35  ;;  %831 = vmatmul.bf16.gmra.mxu2 %v732_v34 }
 0x15e   :  { %1427 = vtanh.f32 %v392_v32  ;;  %v315_v38 = vpop.f32.mrf.mxu0 }
 0x15f   :  { %v638_v39 = vpack.c.bf16 %v554_v37, %v552_v36  ;;  %v316_v47 = vadd.f32 %v1633_v28, %v315_v38 }
 0x161   :  { %v659_v40 = vunpack.c.l.bf16 %v638_v39  ;;  %v660_v41 = vunpack.c.h.bf16 %v638_v39 }
 0x163   :  { %v1426_v42 = vpop.eup %1425  ;;  %1429 = vtanh.f32 %v659_v40 }
 0x164   :  { %v1428_v43 = vpop.eup %1427  ;;  %1431 = vtanh.f32 %v660_v41  ;;  %v556_v44 = vpop.f32.mrf.mxu1 }
 0x165   :  { %v456_v45 = vpack.c.bf16 %v1428_v43, %v1426_v42  ;;  %v557_v56 = vadd.f32 %v1710_v33, %v556_v44 }
 0x166   :  { %v317_v46 = vpop.f32.mrf.mxu0 }
 0x167   :  { %v318_v48 = vadd.f32 %v1633_v28, %v317_v46  ;;  %595 = vmatmul.bf16.gmra.mxu1 %v456_v45 }
 0x169   :  { %v1430_v49 = vpop.eup %1429  ;;  %v362_v50 = vpack.c.bf16 %v318_v48, %v316_v47 }
 0x16a   :  { %v1432_v51 = vpop.eup %1431 }
 0x16b   :  { %v393_v52 = vunpack.c.l.bf16 %v362_v50  ;;  %v394_v53 = vunpack.c.h.bf16 %v362_v50  ;;  %v733_v54 = vpack.c.bf16 %v1432_v51, %v1430_v49 }
 0x16c   :  { %v558_v55 = vpop.f32.mrf.mxu1 }
 0x16d   :  { %1433 = vtanh.f32 %v393_v52  ;;  %v559_v57 = vadd.f32 %v1710_v33, %v558_v55  ;;  %836 = vmatmul.bf16.gmra.mxu2 %v733_v54 }
 0x16e   :  { %1435 = vtanh.f32 %v394_v53  ;;  %v320_v58 = vpop.f32.mrf.mxu0 }
 0x16f   :  { %v639_v59 = vpack.c.bf16 %v559_v57, %v557_v56  ;;  %v321_v3 = vadd.f32 %v1633_v28, %v320_v58 }
 0x171   :  { %v661_v60 = vunpack.c.l.bf16 %v639_v59  ;;  %v662_v61 = vunpack.c.h.bf16 %v639_v59 }
 0x173   :  { %v1434_v62 = vpop.eup %1433  ;;  %1437 = vtanh.f32 %v661_v60 }
 0x174   :  { %v1436_v63 = vpop.eup %1435  ;;  %1439 = vtanh.f32 %v662_v61  ;;  %v561_v0 = vpop.f32.mrf.mxu1 }
 0x175   :  { %v457_v1 = vpack.c.bf16 %v1436_v63, %v1434_v62  ;;  %v562_v12 = vadd.f32 %v1710_v33, %v561_v0 }
 0x176   :  { %v322_v2 = vpop.f32.mrf.mxu0 }
 0x177   :  { %v323_v4 = vadd.f32 %v1633_v28, %v322_v2  ;;  %600 = vmatmul.bf16.gmra.mxu1 %v457_v1 }
 0x179   :  { %v1438_v5 = vpop.eup %1437  ;;  %v363_v6 = vpack.c.bf16 %v323_v4, %v321_v3 }
 0x17a   :  { %v1440_v7 = vpop.eup %1439 }
 0x17b   :  { %v395_v8 = vunpack.c.l.bf16 %v363_v6  ;;  %v396_v9 = vunpack.c.h.bf16 %v363_v6  ;;  %v734_v10 = vpack.c.bf16 %v1440_v7, %v1438_v5 }
 0x17c   :  { %v563_v11 = vpop.f32.mrf.mxu1 }
 0x17d   :  { %1441 = vtanh.f32 %v395_v8  ;;  %v564_v13 = vadd.f32 %v1710_v33, %v563_v11  ;;  %841 = vmatmul.bf16.gmra.mxu2 %v734_v10 }
 0x17e   :  { %1443 = vtanh.f32 %v396_v9  ;;  %v325_v14 = vpop.f32.mrf.mxu0 }
 0x17f   :  { %v640_v15 = vpack.c.bf16 %v564_v13, %v562_v12  ;;  %v326_v23 = vadd.f32 %v1633_v28, %v325_v14 }
 0x181   :  { %v663_v16 = vunpack.c.l.bf16 %v640_v15  ;;  %v664_v17 = vunpack.c.h.bf16 %v640_v15 }
 0x183   :  { %v1442_v18 = vpop.eup %1441  ;;  %1445 = vtanh.f32 %v663_v16 }
 0x184   :  { %v1444_v19 = vpop.eup %1443  ;;  %1447 = vtanh.f32 %v664_v17  ;;  %v566_v20 = vpop.f32.mrf.mxu1 }
 0x185   :  { %v458_v21 = vpack.c.bf16 %v1444_v19, %v1442_v18  ;;  %v567_v34 = vadd.f32 %v1710_v33, %v566_v20 }
 0x186   :  { %v327_v22 = vpop.f32.mrf.mxu0 }
 0x187   :  { %v328_v24 = vadd.f32 %v1633_v28, %v327_v22  ;;  %605 = vmatmul.bf16.gmra.mxu1 %v458_v21 }
 0x189   :  { %v1446_v25 = vpop.eup %1445  ;;  %v364_v26 = vpack.c.bf16 %v328_v24, %v326_v23 }
 0x18a   :  { %v1448_v27 = vpop.eup %1447 }
 0x18b   :  { %v397_v29 = vunpack.c.l.bf16 %v364_v26  ;;  %v398_v30 = vunpack.c.h.bf16 %v364_v26  ;;  %v735_v31 = vpack.c.bf16 %v1448_v27, %v1446_v25 }
 0x18c   :  { %v568_v32 = vpop.f32.mrf.mxu1 }
 0x18d   :  { %1449 = vtanh.f32 %v397_v29  ;;  %v569_v35 = vadd.f32 %v1710_v33, %v568_v32  ;;  %846 = vmatmul.bf16.gmra.mxu2 %v735_v31 }
 0x18e   :  { %1451 = vtanh.f32 %v398_v30 }
 0x18f   :  { %v641_v36 = vpack.c.bf16 %v569_v35, %v567_v34 }
 0x191   :  { %v665_v37 = vunpack.c.l.bf16 %v641_v36  ;;  %v666_v38 = vunpack.c.h.bf16 %v641_v36 }
 0x193   :  { %v1450_v39 = vpop.eup %1449  ;;  %1453 = vtanh.f32 %v665_v37 }
 0x194   :  { %v1452_v28 = vpop.eup %1451  ;;  %1455 = vtanh.f32 %v666_v38  ;;  %v571_v40 = vpop.f32.mrf.mxu1 }
 0x195   :  { %v459_v41 = vpack.c.bf16 %v1452_v28, %v1450_v39  ;;  %v572_v46 = vadd.f32 %v1710_v33, %v571_v40  ;;  %v1753_v40 = vld [vmem:[%s1870_s6] ss:$0 sm:$0xff] }
 0x197   :  { %610 = vmatmul.bf16.gmra.mxu1 %v459_v41 }
 0x199   :  { %v1454_v42 = vpop.eup %1453 }
 0x19a   :  { %v1456_v43 = vpop.eup %1455 }
 0x19b   :  { %v736_v44 = vpack.c.bf16 %v1456_v43, %v1454_v42 }
 0x19c   :  { %v573_v45 = vpop.f32.mrf.mxu1 }
 0x19d   :  { %v574_v47 = vadd.f32 %v1710_v33, %v573_v45  ;;  %851 = vmatmul.bf16.gmra.mxu2 %v736_v44 }
 0x19f   :  { %v642_v48 = vpack.c.bf16 %v574_v47, %v572_v46 }
 0x1a1   :  { %v667_v49 = vunpack.c.l.bf16 %v642_v48  ;;  %v668_v50 = vunpack.c.h.bf16 %v642_v48 }
 0x1a3   :  { %1457 = vtanh.f32 %v667_v49 }
 0x1a4   :  { %1459 = vtanh.f32 %v668_v50  ;;  %v576_v51 = vpop.f32.mrf.mxu1 }
 0x1a5   :  { %v577_v56 = vadd.f32 %v1710_v33, %v576_v51 }
 0x1a9   :  { %v1458_v52 = vpop.eup %1457 }
 0x1aa   :  { %v1460_v53 = vpop.eup %1459 }
 0x1ab   :  { %v737_v54 = vpack.c.bf16 %v1460_v53, %v1458_v52 }
 0x1ac   :  { %v578_v55 = vpop.f32.mrf.mxu1  ;;  %v616_v58 = vpop.f32.mrf.mxu3 }
 0x1ad   :  { %v579_v57 = vadd.f32 %v1710_v33, %v578_v55  ;;  %856 = vmatmul.bf16.gmra.mxu2 %v737_v54  ;;  %v617_v63 = vadd.f32 %v1710_v33, %v616_v58 }
 0x1af   :  { %v643_v59 = vpack.c.bf16 %v579_v57, %v577_v56 }
 0x1b1   :  { %v669_v60 = vunpack.c.l.bf16 %v643_v59  ;;  %v670_v61 = vunpack.c.h.bf16 %v643_v59 }
 0x1b3   :  { %1461 = vtanh.f32 %v669_v60 }
 0x1b4   :  { %1463 = vtanh.f32 %v670_v61  ;;  %v581_v62 = vpop.f32.mrf.mxu1  ;;  %v618_v0 = vpop.f32.mrf.mxu3 }
 0x1b5   :  { %v619_v1 = vadd.f32 %v1710_v33, %v618_v0  ;;  %v582_v9 = vadd.f32 %v1710_v33, %v581_v62 }
 0x1b7   :  { %v651_v2 = vpack.c.bf16 %v619_v1, %v617_v63 }
 0x1b9   :  { %v1462_v3 = vpop.eup %1461  ;;  %v685_v5 = vunpack.c.l.bf16 %v651_v2  ;;  %v686_v6 = vunpack.c.h.bf16 %v651_v2 }
 0x1ba   :  { %v1464_v4 = vpop.eup %1463 }
 0x1bb   :  { %v738_v7 = vpack.c.bf16 %v1464_v4, %v1462_v3  ;;  %1465 = vtanh.f32 %v685_v5 }
 0x1bc   :  { %v583_v8 = vpop.f32.mrf.mxu1  ;;  %1467 = vtanh.f32 %v686_v6  ;;  %v621_v11 = vpop.f32.mrf.mxu3 }
 0x1bd   :  { %v584_v10 = vadd.f32 %v1710_v33, %v583_v8  ;;  %861 = vmatmul.bf16.gmra.mxu2 %v738_v7  ;;  %v622_v19 = vadd.f32 %v1710_v33, %v621_v11 }
 0x1bf   :  { %v644_v12 = vpack.c.bf16 %v584_v10, %v582_v9 }
 0x1c1   :  { %v671_v13 = vunpack.c.l.bf16 %v644_v12  ;;  %v672_v14 = vunpack.c.h.bf16 %v644_v12  ;;  %v1466_v15 = vpop.eup %1465 }
 0x1c2   :  { %v1468_v16 = vpop.eup %1467 }
 0x1c3   :  { %1469 = vtanh.f32 %v671_v13  ;;  %v746_v18 = vpack.c.bf16 %v1468_v16, %v1466_v15 }
 0x1c4   :  { %1471 = vtanh.f32 %v672_v14  ;;  %v586_v17 = vpop.f32.mrf.mxu1  ;;  %v623_v20 = vpop.f32.mrf.mxu3 }
 0x1c5   :  { %901 = vmatmul.bf16.vlgmr.msra.gmra.mxu3 %v746_v18  ;;  %v624_v21 = vadd.f32 %v1710_v33, %v623_v20  ;;  %v587_v30 = vadd.f32 %v1710_v33, %v586_v17 }
 0x1c7   :  { %v652_v23 = vpack.c.bf16 %v624_v21, %v622_v19 }
 0x1c9   :  { %v1470_v22 = vpop.eup %1469  ;;  %v687_v26 = vunpack.c.l.bf16 %v652_v23  ;;  %v688_v27 = vunpack.c.h.bf16 %v652_v23 }
 0x1ca   :  { %v1472_v24 = vpop.eup %1471 }
 0x1cb   :  { %v739_v25 = vpack.c.bf16 %v1472_v24, %v1470_v22  ;;  %1473 = vtanh.f32 %v687_v26 }
 0x1cc   :  { %v588_v29 = vpop.f32.mrf.mxu1  ;;  %1475 = vtanh.f32 %v688_v27  ;;  %v626_v32 = vpop.f32.mrf.mxu3 }
 0x1cd   :  { %v589_v31 = vadd.f32 %v1710_v33, %v588_v29  ;;  %866 = vmatmul.bf16.gmra.mxu2 %v739_v25  ;;  %v627_v41 = vadd.f32 %v1710_v33, %v626_v32 }
 0x1cf   :  { %v645_v34 = vpack.c.bf16 %v589_v31, %v587_v30 }
 0x1d0   :  { %v827_v35 = vpop.f32.mrf.mxu2 }
 0x1d1   :  { %v673_v36 = vunpack.c.l.bf16 %v645_v34  ;;  %v674_v37 = vunpack.c.h.bf16 %v645_v34  ;;  %v1474_v38 = vpop.eup %1473  ;;  %v828_v47 = vadd.f32 %v1753_v40, %v827_v35 }
 0x1d2   :  { %v1476_v39 = vpop.eup %1475 }
 0x1d3   :  { %1477 = vtanh.f32 %v673_v36  ;;  %v747_v42 = vpack.c.bf16 %v1476_v39, %v1474_v38 }
 0x1d4   :  { %1479 = vtanh.f32 %v674_v37  ;;  %v591_v28 = vpop.f32.mrf.mxu1  ;;  %v628_v43 = vpop.f32.mrf.mxu3 }
 0x1d5   :  { %v629_v44 = vadd.f32 %v1710_v33, %v628_v43  ;;  %906 = vmatmul.bf16.gmra.mxu3 %v747_v42  ;;  %v592_v56 = vadd.f32 %v1710_v33, %v591_v28 }
 0x1d7   :  { %v653_v49 = vpack.c.bf16 %v629_v44, %v627_v41 }
 0x1d8   :  { %v829_v45 = vpop.f32.mrf.mxu2 }
 0x1d9   :  { %v1478_v46 = vpop.eup %1477  ;;  %v830_v48 = vadd.f32 %v1753_v40, %v829_v45  ;;  %v689_v53 = vunpack.c.l.bf16 %v653_v49  ;;  %v690_v54 = vunpack.c.h.bf16 %v653_v49 }
 0x1da   :  { %v1480_v50 = vpop.eup %1479 }
 0x1db   :  { %v1220_v51 = vpack.c.bf16 %v830_v48, %v828_v47  ;;  %v740_v52 = vpack.c.bf16 %v1480_v50, %v1478_v46  ;;  %1481 = vtanh.f32 %v689_v53 }
 0x1dc   :  { %v593_v55 = vpop.f32.mrf.mxu1  ;;  %1483 = vtanh.f32 %v690_v54  ;;  %v631_v58 = vpop.f32.mrf.mxu3 }
 0x1dd   :  { %1221 = vst [vmem:[%s1871_s7] sm:$0xff] %v1220_v51   ;;  %v594_v57 = vadd.f32 %v1710_v33, %v593_v55  ;;  %871 = vmatmul.bf16.gmra.mxu2 %v740_v52  ;;  %v632_v2 = vadd.f32 %v1710_v33, %v631_v58 }
 0x1df   :  { %v646_v59 = vpack.c.bf16 %v594_v57, %v592_v56 }
 0x1e0   :  { %v832_v60 = vpop.f32.mrf.mxu2 }
 0x1e1   :  { %v675_v61 = vunpack.c.l.bf16 %v646_v59  ;;  %v676_v62 = vunpack.c.h.bf16 %v646_v59  ;;  %v1482_v63 = vpop.eup %1481  ;;  %v833_v8 = vadd.f32 %v1753_v40, %v832_v60 }
 0x1e2   :  { %v1484_v0 = vpop.eup %1483 }
 0x1e3   :  { %1485 = vtanh.f32 %v675_v61  ;;  %v748_v3 = vpack.c.bf16 %v1484_v0, %v1482_v63 }
 0x1e4   :  { %1487 = vtanh.f32 %v676_v62  ;;  %v596_v1 = vpop.f32.mrf.mxu1  ;;  %v633_v4 = vpop.f32.mrf.mxu3 }
 0x1e5   :  { %v634_v5 = vadd.f32 %v1710_v33, %v633_v4  ;;  %911 = vmatmul.bf16.gmra.mxu3 %v748_v3  ;;  %v597_v17 = vadd.f32 %v1710_v33, %v596_v1 }
 0x1e7   :  { %v654_v10 = vpack.c.bf16 %v634_v5, %v632_v2 }
 0x1e8   :  { %v834_v6 = vpop.f32.mrf.mxu2 }
 0x1e9   :  { %v1486_v7 = vpop.eup %1485  ;;  %v835_v9 = vadd.f32 %v1753_v40, %v834_v6  ;;  %v691_v14 = vunpack.c.l.bf16 %v654_v10  ;;  %v692_v15 = vunpack.c.h.bf16 %v654_v10 }
 0x1ea   :  { %v1488_v11 = vpop.eup %1487 }
 0x1eb   :  { %v1225_v12 = vpack.c.bf16 %v835_v9, %v833_v8  ;;  %v741_v13 = vpack.c.bf16 %v1488_v11, %v1486_v7  ;;  %1489 = vtanh.f32 %v691_v14 }
 0x1ec   :  { %v598_v16 = vpop.f32.mrf.mxu1  ;;  %1491 = vtanh.f32 %v692_v15 }
 0x1ed   :  { %1312 = vst [vmem:[%s1871_s7 + $0x8] sm:$0xff] %v1225_v12   ;;  %v599_v18 = vadd.f32 %v1710_v33, %v598_v16  ;;  %876 = vmatmul.bf16.gmra.mxu2 %v741_v13 }
 0x1ef   :  { %v647_v19 = vpack.c.bf16 %v599_v18, %v597_v17 }
 0x1f0   :  { %v837_v20 = vpop.f32.mrf.mxu2 }
 0x1f1   :  { %v677_v21 = vunpack.c.l.bf16 %v647_v19  ;;  %v678_v22 = vunpack.c.h.bf16 %v647_v19  ;;  %v1490_v23 = vpop.eup %1489  ;;  %v838_v30 = vadd.f32 %v1753_v40, %v837_v20 }
 0x1f2   :  { %v1492_v24 = vpop.eup %1491 }
 0x1f3   :  { %1493 = vtanh.f32 %v677_v21  ;;  %v749_v26 = vpack.c.bf16 %v1492_v24, %v1490_v23 }
 0x1f4   :  { %1495 = vtanh.f32 %v678_v22  ;;  %v601_v25 = vpop.f32.mrf.mxu1 }
 0x1f5   :  { %916 = vmatmul.bf16.gmra.mxu3 %v749_v26  ;;  %v602_v37 = vadd.f32 %v1710_v33, %v601_v25 }
 0x1f8   :  { %v839_v27 = vpop.f32.mrf.mxu2 }
 0x1f9   :  { %v1494_v29 = vpop.eup %1493  ;;  %v840_v31 = vadd.f32 %v1753_v40, %v839_v27 }
 0x1fa   :  { %v1496_v32 = vpop.eup %1495 }
 0x1fb   :  { %v1230_v34 = vpack.c.bf16 %v840_v31, %v838_v30  ;;  %v742_v35 = vpack.c.bf16 %v1496_v32, %v1494_v29 }
 0x1fc   :  { %v603_v36 = vpop.f32.mrf.mxu1 }
 0x1fd   :  { %1313 = vst [vmem:[%s1871_s7 + $0x10] sm:$0xff] %v1230_v34   ;;  %v604_v38 = vadd.f32 %v1710_v33, %v603_v36  ;;  %881 = vmatmul.bf16.gmra.mxu2 %v742_v35 }
 0x1ff   :  { %v648_v39 = vpack.c.bf16 %v604_v38, %v602_v37 }
 0x200   :  { %v842_v28 = vpop.f32.mrf.mxu2 }
 0x201   :  { %v679_v41 = vunpack.c.l.bf16 %v648_v39  ;;  %v680_v42 = vunpack.c.h.bf16 %v648_v39  ;;  %v843_v46 = vadd.f32 %v1753_v40, %v842_v28 }
 0x203   :  { %1497 = vtanh.f32 %v679_v41 }
 0x204   :  { %1499 = vtanh.f32 %v680_v42  ;;  %v606_v43 = vpop.f32.mrf.mxu1 }
 0x205   :  { %v607_v52 = vadd.f32 %v1710_v33, %v606_v43 }
 0x208   :  { %v844_v44 = vpop.f32.mrf.mxu2 }
 0x209   :  { %v1498_v45 = vpop.eup %1497  ;;  %v845_v47 = vadd.f32 %v1753_v40, %v844_v44 }
 0x20a   :  { %v1500_v48 = vpop.eup %1499 }
 0x20b   :  { %v1235_v49 = vpack.c.bf16 %v845_v47, %v843_v46  ;;  %v743_v50 = vpack.c.bf16 %v1500_v48, %v1498_v45 }
 0x20c   :  { %v608_v51 = vpop.f32.mrf.mxu1 }
 0x20d   :  { %1314 = vst [vmem:[%s1871_s7 + $0x18] sm:$0xff] %v1235_v49   ;;  %v609_v53 = vadd.f32 %v1710_v33, %v608_v51  ;;  %886 = vmatmul.bf16.gmra.mxu2 %v743_v50 }
 0x20f   :  { %v649_v54 = vpack.c.bf16 %v609_v53, %v607_v52 }
 0x210   :  { %v847_v55 = vpop.f32.mrf.mxu2 }
 0x211   :  { %v681_v56 = vunpack.c.l.bf16 %v649_v54  ;;  %v682_v57 = vunpack.c.h.bf16 %v649_v54  ;;  %v848_v61 = vadd.f32 %v1753_v40, %v847_v55 }
 0x213   :  { %1501 = vtanh.f32 %v681_v56 }
 0x214   :  { %1503 = vtanh.f32 %v682_v57  ;;  %v611_v58 = vpop.f32.mrf.mxu1 }
 0x215   :  { %v612_v3 = vadd.f32 %v1710_v33, %v611_v58 }
 0x218   :  { %v849_v59 = vpop.f32.mrf.mxu2 }
 0x219   :  { %v1502_v60 = vpop.eup %1501  ;;  %v850_v62 = vadd.f32 %v1753_v40, %v849_v59 }
 0x21a   :  { %v1504_v63 = vpop.eup %1503 }
 0x21b   :  { %v1240_v0 = vpack.c.bf16 %v850_v62, %v848_v61  ;;  %v744_v1 = vpack.c.bf16 %v1504_v63, %v1502_v60 }
 0x21c   :  { %v613_v2 = vpop.f32.mrf.mxu1 }
 0x21d   :  { %1315 = vst [vmem:[%s1871_s7 + $0x20] sm:$0xff] %v1240_v0   ;;  %v614_v4 = vadd.f32 %v1710_v33, %v613_v2  ;;  %891 = vmatmul.bf16.gmra.mxu2 %v744_v1 }
 0x21f   :  { %v650_v5 = vpack.c.bf16 %v614_v4, %v612_v3 }
 0x220   :  { %v852_v6 = vpop.f32.mrf.mxu2 }
 0x221   :  { %v683_v7 = vunpack.c.l.bf16 %v650_v5  ;;  %v684_v8 = vunpack.c.h.bf16 %v650_v5  ;;  %v853_v11 = vadd.f32 %v1753_v40, %v852_v6 }
 0x223   :  { %1505 = vtanh.f32 %v683_v7 }
 0x224   :  { %1507 = vtanh.f32 %v684_v8 }
 0x228   :  { %v854_v9 = vpop.f32.mrf.mxu2 }
 0x229   :  { %v1506_v10 = vpop.eup %1505  ;;  %v855_v12 = vadd.f32 %v1753_v40, %v854_v9 }
 0x22a   :  { %v1508_v13 = vpop.eup %1507 }
 0x22b   :  { %v1245_v14 = vpack.c.bf16 %v855_v12, %v853_v11  ;;  %v745_v15 = vpack.c.bf16 %v1508_v13, %v1506_v10 }
 0x22d   :  { %1316 = vst [vmem:[%s1871_s7 + $0x28] sm:$0xff] %v1245_v14   ;;  %896 = vmatmul.bf16.gmra.mxu2 %v745_v15 }
 0x230   :  { %v857_v33 = vpop.f32.mrf.mxu2 }
 0x231   :  { %v858_v17 = vadd.f32 %v1753_v40, %v857_v33 }
 0x238   :  { %v859_v16 = vpop.f32.mrf.mxu2 }
 0x239   :  { %v860_v18 = vadd.f32 %v1753_v40, %v859_v16 }
 0x23b   :  { %v1250_v19 = vpack.c.bf16 %v860_v18, %v858_v17 }
 0x23d   :  { %1317 = vst [vmem:[%s1871_s7 + $0x30] sm:$0xff] %v1250_v19  }
 0x240   :  { %v862_v20 = vpop.f32.mrf.mxu2 }
 0x241   :  { %v863_v22 = vadd.f32 %v1753_v40, %v862_v20 }
 0x248   :  { %v864_v21 = vpop.f32.mrf.mxu2  ;;  %v902_v24 = vpop.f32.mrf.mxu3 }
 0x249   :  { %v865_v23 = vadd.f32 %v1753_v40, %v864_v21  ;;  %v903_v27 = vadd.f32 %v1753_v40, %v902_v24 }
 0x24b   :  { %v1255_v25 = vpack.c.bf16 %v865_v23, %v863_v22 }
 0x24d   :  { %1318 = vst [vmem:[%s1871_s7 + $0x38] sm:$0xff] %v1255_v25  }
 0x250   :  { %v867_v26 = vpop.f32.mrf.mxu2  ;;  %v904_v29 = vpop.f32.mrf.mxu3 }
 0x251   :  { %v905_v30 = vadd.f32 %v1753_v40, %v904_v29  ;;  %v868_v34 = vadd.f32 %v1753_v40, %v867_v26 }
 0x253   :  { %v1295_v31 = vpack.c.bf16 %v905_v30, %v903_v27 }
 0x255   :  { %1326 = vst [vmem:[%s1871_s7 + $0x78] sm:$0xff] %v1295_v31  }
 0x258   :  { %v869_v32 = vpop.f32.mrf.mxu2  ;;  %v907_v36 = vpop.f32.mrf.mxu3 }
 0x259   :  { %v870_v35 = vadd.f32 %v1753_v40, %v869_v32  ;;  %v908_v39 = vadd.f32 %v1753_v40, %v907_v36 }
 0x25b   :  { %v1260_v37 = vpack.c.bf16 %v870_v35, %v868_v34 }
 0x25d   :  { %1319 = vst [vmem:[%s1871_s7 + $0x40] sm:$0xff] %v1260_v37  }
 0x260   :  { %v872_v38 = vpop.f32.mrf.mxu2  ;;  %v909_v28 = vpop.f32.mrf.mxu3 }
 0x261   :  { %v910_v41 = vadd.f32 %v1753_v40, %v909_v28  ;;  %v873_v44 = vadd.f32 %v1753_v40, %v872_v38 }
 0x263   :  { %v1300_v42 = vpack.c.bf16 %v910_v41, %v908_v39 }
 0x265   :  { %1327 = vst [vmem:[%s1871_s7 + $0x80] sm:$0xff] %v1300_v42  }
 0x268   :  { %v874_v43 = vpop.f32.mrf.mxu2  ;;  %v912_v46 = vpop.f32.mrf.mxu3 }
 0x269   :  { %v875_v45 = vadd.f32 %v1753_v40, %v874_v43  ;;  %v913_v49 = vadd.f32 %v1753_v40, %v912_v46 }
 0x26b   :  { %v1265_v47 = vpack.c.bf16 %v875_v45, %v873_v44 }
 0x26d   :  { %1320 = vst [vmem:[%s1871_s7 + $0x48] sm:$0xff] %v1265_v47  }
 0x270   :  { %v877_v48 = vpop.f32.mrf.mxu2  ;;  %v914_v50 = vpop.f32.mrf.mxu3 }
 0x271   :  { %v915_v51 = vadd.f32 %v1753_v40, %v914_v50  ;;  %v878_v54 = vadd.f32 %v1753_v40, %v877_v48 }
 0x273   :  { %v1305_v52 = vpack.c.bf16 %v915_v51, %v913_v49 }
 0x275   :  { %1328 = vst [vmem:[%s1871_s7 + $0x88] sm:$0xff] %v1305_v52  }
 0x278   :  { %v879_v53 = vpop.f32.mrf.mxu2  ;;  %v917_v56 = vpop.f32.mrf.mxu3 }
 0x279   :  { %v880_v55 = vadd.f32 %v1753_v40, %v879_v53  ;;  %v918_v59 = vadd.f32 %v1753_v40, %v917_v56 }
 0x27b   :  { %v1270_v57 = vpack.c.bf16 %v880_v55, %v878_v54 }
 0x27d   :  { %1321 = vst [vmem:[%s1871_s7 + $0x50] sm:$0xff] %v1270_v57  }
 0x280   :  { %v882_v58 = vpop.f32.mrf.mxu2  ;;  %v919_v60 = vpop.f32.mrf.mxu3 }
 0x281   :  { %v920_v61 = vadd.f32 %v1753_v40, %v919_v60  ;;  %v883_v0 = vadd.f32 %v1753_v40, %v882_v58 }
 0x283   :  { %v1310_v62 = vpack.c.bf16 %v920_v61, %v918_v59 }
 0x285   :  { %1329 = vst [vmem:[%s1871_s7 + $0x90] sm:$0xff] %v1310_v62  }
 0x288   :  { %v884_v63 = vpop.f32.mrf.mxu2 }
 0x289   :  { %v885_v1 = vadd.f32 %v1753_v40, %v884_v63 }
 0x28b   :  { %v1275_v2 = vpack.c.bf16 %v885_v1, %v883_v0 }
 0x28d   :  { %1322 = vst [vmem:[%s1871_s7 + $0x58] sm:$0xff] %v1275_v2  }
 0x290   :  { %v887_v3 = vpop.f32.mrf.mxu2 }
 0x291   :  { %v888_v5 = vadd.f32 %v1753_v40, %v887_v3 }
 0x298   :  { %v889_v4 = vpop.f32.mrf.mxu2 }
 0x299   :  { %v890_v6 = vadd.f32 %v1753_v40, %v889_v4 }
 0x29b   :  { %v1280_v7 = vpack.c.bf16 %v890_v6, %v888_v5 }
 0x29d   :  { %1323 = vst [vmem:[%s1871_s7 + $0x60] sm:$0xff] %v1280_v7  }
 0x2a0   :  { %v892_v8 = vpop.f32.mrf.mxu2 }
 0x2a1   :  { %v893_v10 = vadd.f32 %v1753_v40, %v892_v8 }
 0x2a8   :  { %v894_v9 = vpop.f32.mrf.mxu2 }
 0x2a9   :  { %v895_v11 = vadd.f32 %v1753_v40, %v894_v9 }
 0x2ab   :  { %v1285_v12 = vpack.c.bf16 %v895_v11, %v893_v10 }
 0x2ad   :  { %1324 = vst [vmem:[%s1871_s7 + $0x68] sm:$0xff] %v1285_v12  }
 0x2b0   :  { %v897_v13 = vpop.f32.mrf.mxu2 }
 0x2b1   :  { %v898_v15 = vadd.f32 %v1753_v40, %v897_v13 }
 0x2b8   :  { %v899_v14 = vpop.f32.mrf.mxu2 }
 0x2b9   :  { %v900_v33 = vadd.f32 %v1753_v40, %v899_v14 }
 0x2bb   :  { %v1290_v16 = vpack.c.bf16 %v900_v33, %v898_v15 }
 0x2bd   :  { %1325 = vst [vmem:[%s1871_s7 + $0x70] sm:$0xff] %v1290_v16  }

</bundles_post_ra>
